<compile_context>
chip_gen: v7x
topology: tpu7x:2x2x1
jax: 0.10.0
libtpu: 0.0.40
codegen_flags: <defaults>
</compile_context>

<pallas_src>
import jax
import jax.numpy as jnp
from jax.experimental import pallas as pl
from jax.experimental.pallas import tpu as pltpu

_LANES = 128


# ---------------------------------------------------------------------------
# Kernel (lane-dense packed path — the only path)
# ---------------------------------------------------------------------------

def _packed_kernel(x_ref, m1_ref, b1_ref, w2_ref, b2_ref, o_ref):
    """G logical rows packed per physical row.

    x_ref : [T, G*A_pad] f32   (G*A_pad == 128 for A <= 128: full-lane reads)
    m1_ref: [G*A_pad, G*H] bf16  block-diag fold of (row-sum * 1/(A-1)) and
                                 Linear(1->H)
    b1_ref: [1, G*H] f32         first bias, tiled G times
    w2_ref: [G*H, G*E] bf16      block-diag tile of Linear(H->E) weight
    b2_ref: [1, G*E] f32         second bias, tiled G times
    o_ref : [T, G*E]             G logical output rows packed per physical row
    """
    x = x_ref[...].astype(jnp.bfloat16)                       # bf16 MXU operand
    h = jnp.dot(x, m1_ref[...], preferred_element_type=jnp.float32)
    h = jnp.maximum(h + b1_ref[...], 0.0)                     # bias + ReLU (VPU)
    out = jnp.dot(h.astype(jnp.bfloat16), w2_ref[...],
                  preferred_element_type=jnp.float32)
    o_ref[...] = (out + b2_ref[...]).astype(o_ref.dtype)


# ---------------------------------------------------------------------------
# Wrapper helpers
# ---------------------------------------------------------------------------

def _pad_agents(a):
    """Smallest column count >= a that packs evenly into 128 lanes."""
    if a >= _LANES:
        return ((a + _LANES - 1) // _LANES) * _LANES
    p = 1
    while p < a:
        p *= 2
    return p          # power of two <= 128 always divides 128


def _tpu_query():
    """Best-effort hardware query; safe defaults if unavailable."""
    vmem_bytes, num_cores = 32 << 20, 1
    try:
        info = pltpu.get_tpu_info()
        v = getattr(info, "vmem_capacity_bytes", None)
        if isinstance(v, int) and v > 0:
            vmem_bytes = v
        for name in ("num_tensorcores", "tensorcore_count", "num_cores",
                     "core_count"):
            c = getattr(info, name, None)
            if isinstance(c, int) and c > 0:
                num_cores = c
                break
    except Exception:
        pass
    return vmem_bytes, num_cores


def _pick_tile(nrows, target, num_cores):
    """Large sublane-aligned row tile; split only when >=2 TensorCores."""
    t = min(target, nrows)
    if nrows <= 8:
        return max(1, nrows)                  # full extent is always legal
    t = max(8, (t // 8) * 8)
    if num_cores >= 2 and t >= nrows:
        # Megacore (v7x): leave >= 2 grid steps so both TCs get work.
        t = max(8, (((nrows + num_cores - 1) // num_cores + 7) // 8) * 8)
    return t


def _fold_packed_weights(params, a_pad, g, inv_den):
    """Fold (segmented row-sum * 1/(A-1)) and Linear(1->H) into one dense
    matrix; tile Linear(H->E) block-diagonally so the result stays packed.
    Weights cast to bf16 once (MXU-native; f32 matmul is emulated)."""
    w1, b1, w2, b2 = params["w1"], params["b1"], params["w2"], params["b2"]
    block1 = jnp.ones((a_pad, 1), jnp.float32) * (w1 * inv_den)   # [A_pad, H]
    eye_g = jnp.eye(g, dtype=jnp.float32)
    m1 = jnp.kron(eye_g, block1).astype(jnp.bfloat16)             # [G*A_pad, G*H]
    w2bd = jnp.kron(eye_g, w2).astype(jnp.bfloat16)               # [G*H,  G*E]
    b1t = jnp.tile(b1, (1, g))                                    # [1, G*H] f32
    b2t = jnp.tile(b2, (1, g))                                    # [1, G*E] f32
    return m1, b1t, w2bd, b2t


# ---------------------------------------------------------------------------
# Forward
# ---------------------------------------------------------------------------

def distance_encoder_forward(distance_matrix, params, *, tile_rows=None,
                             out_dtype=jnp.float32):
    """distance_matrix: [B, A, A] float32 -> [B, A, E] (out_dtype, default f32)."""
    B, A, A2 = distance_matrix.shape
    assert A == A2, "distance_matrix must be [batch, agents, agents]"
    H = params["w1"].shape[1]
    E = params["w2"].shape[1]
    N = B * A
    # Matches PyTorch semantics (undefined / inf for A == 1).
    inv_den = (1.0 / (A - 1)) if A > 1 else float("inf")

    vmem_cap, num_cores = _tpu_query()
    if tile_rows is None:
        # Big tiles amortize the ~0.35us/step overhead; go bigger on
        # 128 MiB-VMEM chips (v5e/v6e), keep ~1024 on 64 MiB v7x.
        tile_rows = 2048 if vmem_cap >= (100 << 20) else 1024

    # Lane-dense packing: pad A so it packs evenly into 128 lanes and pad N to
    # a multiple of G. One cheap HBM pad buys full-width DMA reads and
    # unmasked lane-dense stores for every shape (no lane-sparse fallback).
    A_pad = _pad_agents(A)
    G = max(1, _LANES // A_pad)
    N_pad = ((N + G - 1) // G) * G
    Np = N_pad // G
    GA, GH, GE = G * A_pad, G * H, G * E

    d = distance_matrix.reshape(N, A)                 # free row-major reshape
    if A_pad != A or N_pad != N:
        d = jnp.pad(d, ((0, N_pad - N), (0, A_pad - A)))   # zero cols keep sums
    x = d.reshape(Np, GA)                             # free reshape, no copy

    m1, b1t, w2bd, b2t = _fold_packed_weights(params, A_pad, G, inv_den)

    T = _pick_tile(Np, tile_rows, num_cores)
    grid = (pl.cdiv(Np, T),)                          # ragged tail OK, no extra pad

    out_bytes = jnp.dtype(out_dtype).itemsize
    # Double-buffered tiles + double-buffered (small, bf16) constants.
    working_set = (2 * T * GA * 4 + 2 * T * GE * out_bytes
                   + 2 * (GA * GH + GH * GE) * 2 + 2 * (GH + GE) * 4)
    vmem_limit = min(64 << 20, max(16 << 20, int(1.5 * working_set) + (2 << 20)))

    cost = pl.CostEstimate(
        flops=int(2 * Np * (GA * GH + GH * GE)),
        transcendentals=0,
        bytes_accessed=int(4 * Np * GA + out_bytes * Np * GE
                           + 2 * (GA * GH + GH * GE) + 8 * (GH + GE)),
    )

    # TODO(synk): if profiling ever shows MXU-bound on v6e/v7x, pack two vregs
    # of lanes (G = 256 // A_pad) so the first matmul contracts over K=256.
    out_packed = pl.pallas_call(
        _packed_kernel,
        out_shape=jax.ShapeDtypeStruct((Np, GE), out_dtype),
        grid_spec=pltpu.PrefetchScalarGridSpec(
            num_scalar_prefetch=0,
            grid=grid,
            in_specs=[
                pl.BlockSpec((T, GA), lambda i: (i, 0)),
                pl.BlockSpec((GA, GH), lambda i: (0, 0)),
                pl.BlockSpec((1, GH), lambda i: (0, 0)),
                pl.BlockSpec((GH, GE), lambda i: (0, 0)),
                pl.BlockSpec((1, GE), lambda i: (0, 0)),
            ],
            out_specs=pl.BlockSpec((T, GE), lambda i: (i, 0)),
        ),
        compiler_params=pltpu.CompilerParams(
            dimension_semantics=("parallel",),
            vmem_limit_bytes=vmem_limit,
        ),
        cost_estimate=cost,
    )(x, m1, b1t, w2bd, b2t)

    out = out_packed.reshape(N_pad, E)[:N]            # drop padded rows
    return out.reshape(B, A, E)


# ---------------------------------------------------------------------------
# Params + pure-JAX reference
# ---------------------------------------------------------------------------

def init_params(key, embed_dim):
    """Deterministic parameter init (mimics nn.Linear uniform init shapes)."""
    H = embed_dim // 2
    ks = jax.random.split(key, 8)

    def lin(kw, kb, fan_in, fan_out):
        bound = 1.0 / float(fan_in) ** 0.5
        # stored transposed relative to PyTorch: [fan_in, fan_out]
        w = jax.random.uniform(kw, (fan_in, fan_out), jnp.float32, -bound, bound)
        b = jax.random.uniform(kb, (1, fan_out), jnp.float32, -bound, bound)
        return w, b

    w1, b1 = lin(ks[0], ks[1], 1, H)          # distance_net Linear(1, H)
    w2, b2 = lin(ks[2], ks[3], H, embed_dim)  # distance_net Linear(H, E)
    # position_net parameters (unused in forward, kept for shape parity)
    pw1, pb1 = lin(ks[4], ks[5], 3, H)
    pw2, pb2 = lin(ks[6], ks[7], H, embed_dim)
    return {
        "w1": w1, "b1": b1, "w2": w2, "b2": b2,
        "pos_w1": pw1, "pos_b1": pb1, "pos_w2": pw2, "pos_b2": pb2,
    }


def reference_forward(distance_matrix, params):
    """Pure-JAX f32 reference matching the PyTorch forward."""
    _, A, _ = distance_matrix.shape
    avg = distance_matrix.sum(axis=-1, keepdims=True) / (A - 1)    # [B, A, 1]
    h = jnp.maximum(avg @ params["w1"] + params["b1"], 0.0)        # [B, A, H]
    return h @ params["w2"] + params["b2"]                         # [B, A, E]


def _make_distances(key, batch, agents):
    raw = jax.random.uniform(key, (batch, agents, agents), jnp.float32, 0.1, 5.0)
    d = 0.5 * (raw + jnp.swapaxes(raw, -1, -2))
    return d * (1.0 - jnp.eye(agents, dtype=jnp.float32))


if __name__ == "__main__":
    key = jax.random.PRNGKey(0)
    k_param, k1, k2, k3 = jax.random.split(key, 4)

    embed_dim = 32
    params = init_params(k_param, embed_dim)
    fwd = jax.jit(distance_encoder_forward)   # hoists/fuses the weight folding

    # bf16 MXU operands with f32 accumulation -> tolerance loosened vs the
    # pure-f32 reference (review: rounding order + bf16 casting).
    tol = dict(atol=5e-2, rtol=2e-2)

    # Case 1: A=8 divides 128 (G=16) — no padding, fully lane-dense.
    dist = _make_distances(k1, 2, 8)
    out = jax.block_until_ready(fwd(dist, params))
    assert out.shape == (2, 8, embed_dim)
    assert jnp.allclose(out, reference_forward(dist, params), **tol), \
        "packed path (A=8) mismatch"

    # Case 2: A=12 does not divide 128 — padded to 16, still packed path.
    dist2 = _make_distances(k2, 4, 12)
    out2 = jax.block_until_ready(fwd(dist2, params))
    assert out2.shape == (4, 12, embed_dim)
    assert jnp.allclose(out2, reference_forward(dist2, params), **tol), \
        "padded-A path (A=12) mismatch"

    # Case 3: N not a multiple of G — row padding / tail masking locked in.
    dist3 = _make_distances(k3, 5, 8)
    out3 = jax.block_until_ready(fwd(dist3, params))
    assert out3.shape == (5, 8, embed_dim)
    assert jnp.allclose(out3, reference_forward(dist3, params), **tol), \
        "ragged-N path mismatch"

    print("KERNEL_OK")
</pallas_src>

<mosaic_0001>
module attributes {stable_mosaic.version = 11 : i64} {
  func.func @_packed_kernel(%arg0: i32, %arg1: memref<1x128xf32, #tpu.memory_space<vmem>>, %arg2: memref<128x256xbf16, #tpu.memory_space<vmem>>, %arg3: memref<1x256xf32, #tpu.memory_space<vmem>>, %arg4: memref<256x512xbf16, #tpu.memory_space<vmem>>, %arg5: memref<1x512xf32, #tpu.memory_space<vmem>>, %arg6: memref<1x512xf32, #tpu.memory_space<vmem>>) attributes {dimension_semantics = [#tpu.dimension_semantics<parallel>], iteration_bounds = array<i64: 1>, scalar_prefetch = 0 : i64, scratch_operands = 0 : i64, tpu.core_type = #tpu.core_type<tc>, window_params = [{transform_indices = @transform_0, window_bounds = array<i64: 1, 128>}, {pipeline_mode = #tpu.pipeline_mode<synchronous>, transform_indices = @transform_1, window_bounds = array<i64: 128, 256>}, {pipeline_mode = #tpu.pipeline_mode<synchronous>, transform_indices = @transform_2, window_bounds = array<i64: 1, 256>}, {pipeline_mode = #tpu.pipeline_mode<synchronous>, transform_indices = @transform_3, window_bounds = array<i64: 256, 512>}, {pipeline_mode = #tpu.pipeline_mode<synchronous>, transform_indices = @transform_4, window_bounds = array<i64: 1, 512>}, {transform_indices = @transform_5, window_bounds = array<i64: 1, 512>}]} {
    %c0 = arith.constant 0 : index
    %c0_0 = arith.constant 0 : index
    %0 = vector.load %arg1[%c0, %c0_0] : memref<1x128xf32, #tpu.memory_space<vmem>>, vector<1x128xf32>
    %1 = arith.truncf %0 : vector<1x128xf32> to vector<1x128xbf16>
    %c0_1 = arith.constant 0 : index
    %c0_2 = arith.constant 0 : index
    %2 = vector.load %arg2[%c0_1, %c0_2] : memref<128x256xbf16, #tpu.memory_space<vmem>>, vector<128x256xbf16>
    %cst = arith.constant dense<0.000000e+00> : vector<1x256xf32>
    %3 = tpu.matmul %1, %2, %cst {dimension_numbers = #tpu.dot_dimension_numbers<[1], [0], [0], [1], [0, 0, 1, 1], [], []>} : vector<1x128xbf16>, vector<128x256xbf16>, vector<1x256xf32> -> vector<1x256xf32>
    %c0_3 = arith.constant 0 : index
    %c0_4 = arith.constant 0 : index
    %4 = vector.load %arg3[%c0_3, %c0_4] : memref<1x256xf32, #tpu.memory_space<vmem>>, vector<1x256xf32>
    %5 = arith.addf %3, %4 : vector<1x256xf32>
    %cst_5 = arith.constant 0.000000e+00 : f32
    %6 = vector.broadcast %cst_5 : f32 to vector<1x256xf32>
    %7 = arith.maximumf %5, %6 : vector<1x256xf32>
    %8 = arith.truncf %7 : vector<1x256xf32> to vector<1x256xbf16>
    %c0_6 = arith.constant 0 : index
    %c0_7 = arith.constant 0 : index
    %9 = vector.load %arg4[%c0_6, %c0_7] : memref<256x512xbf16, #tpu.memory_space<vmem>>, vector<256x512xbf16>
    %cst_8 = arith.constant dense<0.000000e+00> : vector<1x512xf32>
    %10 = tpu.matmul %8, %9, %cst_8 {dimension_numbers = #tpu.dot_dimension_numbers<[1], [0], [0], [1], [0, 0, 1, 1], [], []>} : vector<1x256xbf16>, vector<256x512xbf16>, vector<1x512xf32> -> vector<1x512xf32>
    %c0_9 = arith.constant 0 : index
    %c0_10 = arith.constant 0 : index
    %11 = vector.load %arg5[%c0_9, %c0_10] : memref<1x512xf32, #tpu.memory_space<vmem>>, vector<1x512xf32>
    %12 = arith.addf %10, %11 : vector<1x512xf32>
    %c0_11 = arith.constant 0 : index
    %c0_12 = arith.constant 0 : index
    %13 = vector.load %arg6[%c0_11, %c0_12] : memref<1x512xf32, #tpu.memory_space<vmem>>, vector<1x512xf32>
    tpu.vector_store %arg6[%c0_11, %c0_12], %12 {strides = array<i32>} : memref<1x512xf32, #tpu.memory_space<vmem>>, vector<1x512xf32>,
    return
  }
  func.func @transform_0(%arg0: i32) -> (i32, i32) {
    %c0_i32 = arith.constant 0 : i32
    %c0_i32_0 = arith.constant 0 : i32
    return %arg0, %c0_i32 : i32, i32
  }
  func.func @transform_1(%arg0: i32) -> (i32, i32) {
    %c0_i32 = arith.constant 0 : i32
    %c0_i32_0 = arith.constant 0 : i32
    %c0_i32_1 = arith.constant 0 : i32
    return %c0_i32, %c0_i32_0 : i32, i32
  }
  func.func @transform_2(%arg0: i32) -> (i32, i32) {
    %c0_i32 = arith.constant 0 : i32
    %c0_i32_0 = arith.constant 0 : i32
    %c0_i32_1 = arith.constant 0 : i32
    return %c0_i32, %c0_i32_0 : i32, i32
  }
  func.func @transform_3(%arg0: i32) -> (i32, i32) {
    %c0_i32 = arith.constant 0 : i32
    %c0_i32_0 = arith.constant 0 : i32
    %c0_i32_1 = arith.constant 0 : i32
    return %c0_i32, %c0_i32_0 : i32, i32
  }
  func.func @transform_4(%arg0: i32) -> (i32, i32) {
    %c0_i32 = arith.constant 0 : i32
    %c0_i32_0 = arith.constant 0 : i32
    %c0_i32_1 = arith.constant 0 : i32
    return %c0_i32, %c0_i32_0 : i32, i32
  }
  func.func @transform_5(%arg0: i32) -> (i32, i32) {
    %c0_i32 = arith.constant 0 : i32
    %c0_i32_0 = arith.constant 0 : i32
    return %arg0, %c0_i32 : i32, i32
  }
}

</mosaic_0001>

<bundles_post_ra>
// kernel: distance_encoder_forward.1
= control target key start
LH: loop header
LB: loop body
LE: loop exit
PB: predicated region body
PF: predicated region fallthrough
CT: control target
= control target key end

     0   :  { %v904_v1 = vmov 0   ;;  %s1188_s1 = inlined_call_operand.vmem [shape: bf16[128,256], index: 1, kind: input, shape index: {}]   ;;  %s1189_s3 = inlined_call_operand.vmem [shape: bf16[256,512], index: 3, kind: input, shape index: {}]   ;;  %s1190_s0 = inlined_call_operand.vmem [shape: f32[1,128], index: 0, kind: input, shape index: {}]   ;;  %s1191_s2 = inlined_call_operand.vmem [shape: f32[1,256], index: 2, kind: input, shape index: {}]   ;;  %s1192_s4 = inlined_call_operand.vmem [shape: f32[1,512], index: 4, kind: input, shape index: {}]   ;;  %s1193_s5 = inlined_call_operand.vmem [shape: f32[1,512], index: 5, kind: output, shape index: {}]  }
   0x1   :  { %v784_v0 = vld [vmem:[%s1188_s1 + $0x4] ss:$8 sps:$4 sm:$0xff]   ;;  %163 = vmatprep.mubr.bf16.mxu0 %v904_v1  ;;  %v786_v2 = vld [vmem:[%s1188_s1] ss:$8 sps:$4 sm:$0xff]   ;;  %v787_v3 = vld [vmem:[%s1188_s1 + $0x14] ss:$8 sps:$4 sm:$0xff]  }
   0x2   :  { %131 = vmatprep.subr.bf16.mxu0 %v784_v0  ;;  %v789_v4 = vld [vmem:[%s1188_s1 + $0x10] ss:$8 sps:$4 sm:$0xff]   ;;  %v790_v5 = vld [vmem:[%s1188_s1 + $0x24] ss:$8 sps:$4 sm:$0xff]   ;;  %v792_v6 = vld [vmem:[%s1188_s1 + $0x20] ss:$8 sps:$4 sm:$0xff]  }
   0x3   :  { %132 = vmatpush1.bf16.msra.mxu0 %v786_v2  ;;  %v793_v7 = vld [vmem:[%s1188_s1 + $0x34] ss:$8 sps:$4 sm:$0xff]   ;;  %v795_v8 = vld [vmem:[%s1188_s1 + $0x30] ss:$8 sps:$4 sm:$0xff]   ;;  %v796_v10 = vld [vmem:[%s1188_s1 + $0x44] ss:$8 sps:$4 sm:$0xff]  }
   0x4   :  { %133 = vmatprep.subr.bf16.mxu0 %v787_v3  ;;  %v808_v9 = vld [vmem:[%s1189_s3 + $0x4] ss:$16 sps:$4 sm:$0xff]   ;;  %v813_v11 = vld [vmem:[%s1189_s3] ss:$16 sps:$4 sm:$0xff]   ;;  %v812_v27 = vld [vmem:[%s1189_s3 + $0xc] ss:$16 sps:$4 sm:$0xff]  }
   0x5   :  { %582 = vmatprep.subr.bf16.mxu1 %v808_v9  ;;  %v814_v12 = vld [vmem:[%s1189_s3 + $0x24] ss:$16 sps:$4 sm:$0xff]   ;;  %v798_v13 = vld [vmem:[%s1188_s1 + $0x40] ss:$8 sps:$4 sm:$0xff]   ;;  %v801_v17 = vld [vmem:[%s1188_s1 + $0x50] ss:$8 sps:$4 sm:$0xff]  }
   0x6   :  { %v799_v14 = vld [vmem:[%s1188_s1 + $0x54] ss:$8 sps:$4 sm:$0xff]   ;;  %583 = vmatpush1.bf16.msra.mxu1 %v813_v11  ;;  %v819_v15 = vld [vmem:[%s1189_s3 + $0x20] ss:$16 sps:$4 sm:$0xff]   ;;  %v802_v18 = vld [vmem:[%s1188_s1 + $0x64] ss:$8 sps:$4 sm:$0xff]  }
   0x7   :  { %134 = vmatpush1.bf16.msra.mxu0 %v789_v4  ;;  %584 = vmatprep.subr.bf16.mxu1 %v814_v12  ;;  %v820_v16 = vld [vmem:[%s1189_s3 + $0x44] ss:$16 sps:$4 sm:$0xff]   ;;  %v825_v19 = vld [vmem:[%s1189_s3 + $0x40] ss:$16 sps:$4 sm:$0xff]   ;;  %v810_v31 = vld [vmem:[%s1189_s3 + $0x8] ss:$16 sps:$4 sm:$0xff]  }
   0x8   :  { %135 = vmatprep.subr.bf16.mxu0 %v790_v5  ;;  %v826_v20 = vld [vmem:[%s1189_s3 + $0x64] ss:$16 sps:$4 sm:$0xff]   ;;  %v804_v21 = vld [vmem:[%s1188_s1 + $0x60] ss:$8 sps:$4 sm:$0xff]   ;;  %v807_v25 = vld [vmem:[%s1188_s1 + $0x70] ss:$8 sps:$4 sm:$0xff]  }
   0x9   :  { %v805_v22 = vld [vmem:[%s1188_s1 + $0x74] ss:$8 sps:$4 sm:$0xff]   ;;  %v831_v23 = vld [vmem:[%s1189_s3 + $0x60] ss:$16 sps:$4 sm:$0xff]   ;;  %v816_v35 = vld [vmem:[%s1189_s3 + $0x28] ss:$16 sps:$4 sm:$0xff]  }
   0xa   :  { %585 = vmatpush1.bf16.msra.mxu1 %v819_v15  ;;  %v832_v24 = vld [vmem:[%s1189_s3 + $0x84] ss:$16 sps:$4 sm:$0xff]   ;;  %v21_v26 = vld [vmem:[%s1190_s0] sm:$0x1]  ;;  %v818_v32 = vld [vmem:[%s1189_s3 + $0x2c] ss:$16 sps:$4 sm:$0xff]  }
   0xb   :  { %136 = vmatpush1.bf16.msra.mxu0 %v792_v6  ;;  %586 = vmatprep.subr.bf16.mxu1 %v820_v16  ;;  %v837_v28 = vld [vmem:[%s1189_s3 + $0x80] ss:$16 sps:$4 sm:$0xff]   ;;  %v838_v29 = vld [vmem:[%s1189_s3 + $0xa4] ss:$16 sps:$4 sm:$0xff]   ;;  %v22_v30 = vpack.c.bf16 %v21_v26, %v21_v26  ;;  %v824_v36 = vld [vmem:[%s1189_s3 + $0x4c] ss:$16 sps:$4 sm:$0xff]  }
   0xc   :  { %137 = vmatprep.subr.bf16.mxu0 %v793_v7  ;;  %v843_v33 = vld [vmem:[%s1189_s3 + $0xa0] ss:$16 sps:$4 sm:$0xff]   ;;  %v844_v34 = vld [vmem:[%s1189_s3 + $0xc4] ss:$16 sps:$4 sm:$0xff]   ;;  %v822_v39 = vld [vmem:[%s1189_s3 + $0x48] ss:$16 sps:$4 sm:$0xff]  }
   0xd   :  { %v849_v37 = vld [vmem:[%s1189_s3 + $0xc0] ss:$16 sps:$4 sm:$0xff]   ;;  %v850_v38 = vld [vmem:[%s1189_s3 + $0xe4] ss:$16 sps:$4 sm:$0xff]   ;;  %v830_v40 = vld [vmem:[%s1189_s3 + $0x6c] ss:$16 sps:$4 sm:$0xff]  }
   0xe   :  { %587 = vmatpush1.bf16.msra.mxu1 %v825_v19  ;;  %v855_v41 = vld [vmem:[%s1189_s3 + $0xe0] ss:$16 sps:$4 sm:$0xff]   ;;  %v856_v42 = vld [vmem:[%s1189_s3 + $0x104] ss:$16 sps:$4 sm:$0xff]   ;;  %v828_v43 = vld [vmem:[%s1189_s3 + $0x68] ss:$16 sps:$4 sm:$0xff]   ;;  %v121_v19 = vlaneseq }
   0xf   :  { %138 = vmatpush1.bf16.msra.mxu0 %v795_v8  ;;  %588 = vmatprep.subr.bf16.mxu1 %v826_v20  ;;  %v836_v44 = vld [vmem:[%s1189_s3 + $0x8c] ss:$16 sps:$4 sm:$0xff]   ;;  %v861_v45 = vld [vmem:[%s1189_s3 + $0x100] ss:$16 sps:$4 sm:$0xff]   ;;  %v862_v46 = vld [vmem:[%s1189_s3 + $0x124] ss:$16 sps:$4 sm:$0xff]  }
  0x10   :  { %139 = vmatprep.subr.bf16.mxu0 %v796_v10  ;;  %v834_v47 = vld [vmem:[%s1189_s3 + $0x88] ss:$16 sps:$4 sm:$0xff]   ;;  %v867_v48 = vld [vmem:[%s1189_s3 + $0x120] ss:$16 sps:$4 sm:$0xff]   ;;  %v842_v49 = vld [vmem:[%s1189_s3 + $0xac] ss:$16 sps:$4 sm:$0xff]  }
  0x11   :  { %v868_v50 = vld [vmem:[%s1189_s3 + $0x144] ss:$16 sps:$4 sm:$0xff]   ;;  %v840_v51 = vld [vmem:[%s1189_s3 + $0xa8] ss:$16 sps:$4 sm:$0xff]   ;;  %v873_v52 = vld [vmem:[%s1189_s3 + $0x140] ss:$16 sps:$4 sm:$0xff]  }
  0x12   :  { %589 = vmatpush1.bf16.msra.mxu1 %v831_v23  ;;  %v848_v53 = vld [vmem:[%s1189_s3 + $0xcc] ss:$16 sps:$4 sm:$0xff]   ;;  %v874_v54 = vld [vmem:[%s1189_s3 + $0x164] ss:$16 sps:$4 sm:$0xff]   ;;  %v846_v55 = vld [vmem:[%s1189_s3 + $0xc8] ss:$16 sps:$4 sm:$0xff]  }
  0x13   :  { %140 = vmatpush1.bf16.msra.mxu0 %v798_v13  ;;  %590 = vmatprep.subr.bf16.mxu1 %v832_v24  ;;  %v879_v56 = vld [vmem:[%s1189_s3 + $0x160] ss:$16 sps:$4 sm:$0xff]   ;;  %v854_v57 = vld [vmem:[%s1189_s3 + $0xec] ss:$16 sps:$4 sm:$0xff]   ;;  %v880_v58 = vld [vmem:[%s1189_s3 + $0x184] ss:$16 sps:$4 sm:$0xff]  }
  0x14   :  { %141 = vmatprep.subr.bf16.mxu0 %v799_v14  ;;  %v852_v59 = vld [vmem:[%s1189_s3 + $0xe8] ss:$16 sps:$4 sm:$0xff]   ;;  %v885_v60 = vld [vmem:[%s1189_s3 + $0x180] ss:$16 sps:$4 sm:$0xff]   ;;  %v860_v61 = vld [vmem:[%s1189_s3 + $0x10c] ss:$16 sps:$4 sm:$0xff]  }
  0x15   :  { %v886_v62 = vld [vmem:[%s1189_s3 + $0x1a4] ss:$16 sps:$4 sm:$0xff]   ;;  %v858_v63 = vld [vmem:[%s1189_s3 + $0x108] ss:$16 sps:$4 sm:$0xff]   ;;  %v891_v0 = vld [vmem:[%s1189_s3 + $0x1a0] ss:$16 sps:$4 sm:$0xff]  }
  0x16   :  { %591 = vmatpush1.bf16.msra.mxu1 %v837_v28  ;;  %v866_v1 = vld [vmem:[%s1189_s3 + $0x12c] ss:$16 sps:$4 sm:$0xff]   ;;  %v864_v2 = vld [vmem:[%s1189_s3 + $0x128] ss:$16 sps:$4 sm:$0xff]   ;;  %v892_v11 = vld [vmem:[%s1189_s3 + $0x1c4] ss:$16 sps:$4 sm:$0xff]  }
  0x17   :  { %142 = vmatpush1.bf16.msra.mxu0 %v801_v17  ;;  %592 = vmatprep.subr.bf16.mxu1 %v838_v29  ;;  %v872_v3 = vld [vmem:[%s1189_s3 + $0x14c] ss:$16 sps:$4 sm:$0xff]   ;;  %v870_v4 = vld [vmem:[%s1189_s3 + $0x148] ss:$16 sps:$4 sm:$0xff]   ;;  %v897_v14 = vld [vmem:[%s1189_s3 + $0x1c0] ss:$16 sps:$4 sm:$0xff]  }
  0x18   :  { %143 = vmatprep.subr.bf16.mxu0 %v802_v18  ;;  %v878_v5 = vld [vmem:[%s1189_s3 + $0x16c] ss:$16 sps:$4 sm:$0xff]   ;;  %v876_v6 = vld [vmem:[%s1189_s3 + $0x168] ss:$16 sps:$4 sm:$0xff]   ;;  %v898_v15 = vld [vmem:[%s1189_s3 + $0x1e4] ss:$16 sps:$4 sm:$0xff]  }
  0x19   :  { %v884_v7 = vld [vmem:[%s1189_s3 + $0x18c] ss:$16 sps:$4 sm:$0xff]   ;;  %v882_v8 = vld [vmem:[%s1189_s3 + $0x188] ss:$16 sps:$4 sm:$0xff]   ;;  %v903_v18 = vld [vmem:[%s1189_s3 + $0x1e0] ss:$16 sps:$4 sm:$0xff]  }
  0x1a   :  { %593 = vmatpush1.bf16.msra.mxu1 %v843_v33  ;;  %v890_v9 = vld [vmem:[%s1189_s3 + $0x1ac] ss:$16 sps:$4 sm:$0xff]   ;;  %v888_v10 = vld [vmem:[%s1189_s3 + $0x1a8] ss:$16 sps:$4 sm:$0xff]   ;;  %v122_v20 = vshrl.u32 %v121_v19, 7  ;;  %vm695_vm0 = vcmp.lt.s32.totalorder %v121_v19, 512 }
  0x1b   :  { %144 = vmatpush1.bf16.msra.mxu0 %v804_v21  ;;  %594 = vmatprep.subr.bf16.mxu1 %v844_v34  ;;  %v896_v12 = vld [vmem:[%s1189_s3 + $0x1cc] ss:$16 sps:$4 sm:$0xff]   ;;  %v894_v13 = vld [vmem:[%s1189_s3 + $0x1c8] ss:$16 sps:$4 sm:$0xff]  }
  0x1c   :  { %145 = vmatprep.subr.bf16.mxu0 %v805_v22  ;;  %v902_v16 = vld [vmem:[%s1189_s3 + $0x1ec] ss:$16 sps:$4 sm:$0xff]   ;;  %v900_v17 = vld [vmem:[%s1189_s3 + $0x1e8] ss:$16 sps:$4 sm:$0xff]   ;;  %v123_v21 = vsub.s32 0, %v122_v20  ;;  %v127_v23 = vsub.s32 1, %v122_v20 }
  0x1d   :  { %v39_v22 = vld [vmem:[%s1191_s2] sm:$0x3] }
  0x1e   :  { %595 = vmatpush1.bf16.msra.mxu1 %v849_v37  ;;  %v124_v24 = vrot.slane %v39_v22, %v123_v21  ;;  %v240_v37 = vld [vmem:[%s1192_s4] sm:$0xf] }
  0x1f   :  { %146 = vmatpush1.bf16.msra.mxu0 %v807_v25  ;;  %596 = vmatprep.subr.bf16.mxu1 %v850_v38  ;;  %v128_v25 = vrot.slane %v39_v22, %v127_v23  ;;  %v905_v38 = vmov 1966171168  }
  0x20   :  { %623 = vmatprep.subr.bf16.mxu0 %v812_v27 }
  0x22   :  { %164 = vmatmul.mubr.bf16.vlgmr.msra.gmra.mrb[0].mxu0 %v22_v30  ;;  %597 = vmatpush1.bf16.msra.mxu1 %v855_v41  ;;  %v565_v41 = vrot.slane %v240_v37, %v123_v21 }
  0x23   :  { %624 = vmatpush1.bf16.msra.mxu0 %v810_v31  ;;  %598 = vmatprep.subr.bf16.mxu1 %v856_v42 }
  0x24   :  { %625 = vmatprep.subr.bf16.mxu0 %v818_v32 }
  0x26   :  { %599 = vmatpush1.bf16.msra.mxu1 %v861_v45 }
  0x27   :  { %626 = vmatpush1.bf16.msra.mxu0 %v816_v35  ;;  %600 = vmatprep.subr.bf16.mxu1 %v862_v46 }
  0x28   :  { %627 = vmatprep.subr.bf16.mxu0 %v824_v36  ;;  %v572_v36 = vsub.s32 2, %v122_v20 }
  0x2a   :  { %601 = vmatpush1.bf16.msra.mxu1 %v867_v48  ;;  %v573_v42 = vrot.slane %v240_v37, %v572_v36 }
  0x2b   :  { %628 = vmatpush1.bf16.msra.mxu0 %v822_v39  ;;  %602 = vmatprep.subr.bf16.mxu1 %v868_v50  ;;  %v671_v39 = vunpack.c.l.s4 %v905_v38 }
  0x2c   :  { %629 = vmatprep.subr.bf16.mxu0 %v830_v40  ;;  %v576_v40 = vsub.s32 3, %v122_v20 }
  0x2e   :  { %603 = vmatpush1.bf16.msra.mxu1 %v873_v52  ;;  %v577_v45 = vrot.slane %v240_v37, %v576_v40 }
  0x2f   :  { %630 = vmatpush1.bf16.msra.mxu0 %v828_v43  ;;  %604 = vmatprep.subr.bf16.mxu1 %v874_v54  ;;  %v569_v43 = vrot.slane %v240_v37, %v127_v23 }
  0x30   :  { %631 = vmatprep.subr.bf16.mxu0 %v836_v44  ;;  %v672_v44 = vunpack.c.0.s8 %v671_v39 }
  0x32   :  { %605 = vmatpush1.bf16.msra.mxu1 %v879_v56 }
  0x33   :  { %632 = vmatpush1.bf16.msra.mxu0 %v834_v47  ;;  %606 = vmatprep.subr.bf16.mxu1 %v880_v58 }
  0x34   :  { %633 = vmatprep.subr.bf16.mxu0 %v842_v49 }
  0x36   :  { %607 = vmatpush1.bf16.msra.mxu1 %v885_v60 }
  0x37   :  { %634 = vmatpush1.bf16.msra.mxu0 %v840_v51  ;;  %608 = vmatprep.subr.bf16.mxu1 %v886_v62 }
  0x38   :  { %635 = vmatprep.subr.bf16.mxu0 %v848_v53  ;;  %v675_v53 = vsub.s32 %v672_v44, %v122_v20 }
  0x3a   :  { %609 = vmatpush1.bf16.msra.mxu1 %v891_v0 }
  0x3b   :  { %636 = vmatpush1.bf16.msra.mxu0 %v846_v55  ;;  %610 = vmatprep.subr.bf16.mxu1 %v892_v11 }
  0x3c   :  { %637 = vmatprep.subr.bf16.mxu0 %v854_v57 }
  0x3e   :  { %611 = vmatpush1.bf16.msra.mxu1 %v897_v14 }
  0x3f   :  { %638 = vmatpush1.bf16.msra.mxu0 %v852_v59  ;;  %612 = vmatprep.subr.bf16.mxu1 %v898_v15 }
  0x40   :  { %639 = vmatprep.subr.bf16.mxu0 %v860_v61 }
  0x42   :  { %613 = vmatpush1.bf16.msra.mxu1 %v903_v18 }
  0x43   :  { %640 = vmatpush1.bf16.msra.mxu0 %v858_v63 }
  0x44   :  { %641 = vmatprep.subr.bf16.mxu0 %v866_v1 }
  0x47   :  { %642 = vmatpush1.bf16.msra.mxu0 %v864_v2 }
  0x48   :  { %643 = vmatprep.subr.bf16.mxu0 %v872_v3 }
  0x4b   :  { %644 = vmatpush1.bf16.msra.mxu0 %v870_v4 }
  0x4c   :  { %645 = vmatprep.subr.bf16.mxu0 %v878_v5 }
  0x4f   :  { %646 = vmatpush1.bf16.msra.mxu0 %v876_v6 }
  0x50   :  { %647 = vmatprep.subr.bf16.mxu0 %v884_v7 }
  0x53   :  { %648 = vmatpush1.bf16.msra.mxu0 %v882_v8 }
  0x54   :  { %649 = vmatprep.subr.bf16.mxu0 %v890_v9 }
  0x57   :  { %650 = vmatpush1.bf16.msra.mxu0 %v888_v10 }
  0x58   :  { %651 = vmatprep.subr.bf16.mxu0 %v896_v12 }
  0x5b   :  { %652 = vmatpush1.bf16.msra.mxu0 %v894_v13 }
  0x5c   :  { %653 = vmatprep.subr.bf16.mxu0 %v902_v16 }
  0x5f   :  { %654 = vmatpush1.bf16.msra.mxu0 %v900_v17 }
  0xf5   :  { %v165_v26 = vpop.f32.mrb[0].mxu0 }
  0xf6   :  { %v166_v27 = vadd.f32 %v165_v26, %v124_v24  ;;  %v167_v28 = vpop.f32.mrb[1].mxu0 }
  0xf7   :  { %v168_v29 = vadd.f32 %v167_v28, %v128_v25  ;;  %v169_v30 = vpop.f32.mrb[2].mxu0 }
  0xf8   :  { %v172_v31 = vmax.f32 %v166_v27, 0.0  ;;  %v170_v32 = vpop.f32.mrb[3].mxu0 }
  0xf9   :  { %v173_v33 = vmax.f32 %v168_v29, 0.0 }
  0xfa   :  { %v174_v35 = vpack.c.bf16 %v172_v31, %v172_v31 }
  0xfb   :  { %v175_v34 = vpack.c.bf16 %v173_v33, %v173_v33 }
  0xfd   :  { %614 = vmatprep.mubr.bf16.mxu1 %v175_v34  ;;  %655 = vmatprep.mubr.bf16.mxu0 %v175_v34 }
  0xfe   :  { %615 = vmatmul.mubr.bf16.vlgmr.msra.gmra.mrb[0].mxu1 %v174_v35  ;;  %656 = vmatmul.mubr.bf16.vlgmr.msra.gmra.mrb[4].mxu0 %v174_v35 }
 0x1d1   :  { %v616_v46 = vpop.f32.mrb[0].mxu1  ;;  %v657_v47 = vpop.f32.mrb[4].mxu0 }
 0x1d2   :  { %v617_v48 = vadd.f32 %v616_v46, %v565_v41  ;;  %v658_v49 = vadd.f32 %v657_v47, %v573_v42  ;;  %v618_v50 = vpop.f32.mrb[1].mxu1  ;;  %v659_v51 = vpop.f32.mrb[5].mxu0 }
 0x1d3   :  { %v619_v52 = vadd.f32 %v618_v50, %v569_v43  ;;  %v660_v54 = vadd.f32 %v659_v51, %v577_v45  ;;  %v620_v55 = vpop.f32.mrb[2].mxu1  ;;  %v661_v56 = vpop.f32.mrb[6].mxu0 }
 0x1d4   :  { %v621_v57 = vpop.f32.mrb[3].mxu1  ;;  %v662_v58 = vpop.f32.mrb[7].mxu0 }
 0x1d5   :  { %v668_v59 = vcombine.low %v617_v48, %v619_v52  ;;  %v669_v60 = vcombine.low %v658_v49, %v660_v54 }
 0x1d7   :  { %v676_v61 = vrot.slane %v668_v59, %v675_v53  ;;  %v683_v62 = vrot.slane %v669_v60, %v675_v53 }
 0x1d9   :  { %v684_v63 = vcombine.low %v676_v61, %v683_v62 }
 0x1db   :  { %v691_v0 = vrot.slane %v684_v63, %v675_v53 }
 0x1dd   :  { %697 = vst.msk [vmem:[%s1193_s5] sm:$0xf] %vm695_vm0, %v691_v0 }

</bundles_post_ra>
